<compile_context>
chip_gen: v7x
topology: tpu7x:2x2x1
jax: 0.10.0
libtpu: 0.0.40
codegen_flags: <defaults>
</compile_context>

<pallas_src>
import jax
import jax.numpy as jnp
from jax.experimental import pallas as pl
from jax.experimental.pallas import tpu as pltpu

_LANE = 128
_SUBLANE = 8


def _cdiv(a, b):
    return -(-a // b)


def _round_up(x, m):
    return _cdiv(x, m) * m


def classifier_head(x_nchw, weight, bias, *, weight_dtype=None):
    """ClassifierHead.forward (global avg pool + Linear) as a Pallas kernel.

    Args:
      x_nchw: (N, C, H, W) activations (NCHW as produced by the torch module).
      weight: (K, C) nn.Linear weight (out_features x in_features).
      bias:   (K,)   nn.Linear bias.
      weight_dtype: dtype of the resident weight inside the kernel.  Default:
        bf16 if activations/weight are bf16 (halves its VMEM + native MXU
        rate), f32 otherwise (keeps reference tolerance).
    Returns:
      (N, K) logits in x_nchw.dtype.
    """
    N, C, H, W = x_nchw.shape
    K = int(weight.shape[0])
    assert K >= 1, "num_classes == 0 (nn.Identity fc) is not implemented"
    HW = H * W

    out_dtype = x_nchw.dtype
    x_item = jnp.dtype(x_nchw.dtype).itemsize
    if weight_dtype is None:
        bf16 = jnp.dtype(jnp.bfloat16)
        weight_dtype = (jnp.bfloat16
                        if (jnp.dtype(x_nchw.dtype) == bf16
                            or jnp.dtype(weight.dtype) == bf16)
                        else jnp.float32)
    w_item = jnp.dtype(weight_dtype).itemsize
    out_item = jnp.dtype(out_dtype).itemsize

    # (N, C, H, W) -> (N, C, HW): contiguous collapse, no HBM data movement.
    x = x_nchw.reshape(N, C, HW)

    # Fold 1/(H*W) into the small resident weight; pad K to a lane-dense
    # multiple of 128 with zeros (padded logits are sliced off at the end).
    Kp = _round_up(K, _LANE)
    w_t = (weight.T.astype(jnp.float32) * (1.0 / float(HW))).astype(weight_dtype)
    b = bias.astype(jnp.float32).reshape(1, K)
    if Kp != K:
        w_t = jnp.pad(w_t, ((0, 0), (0, Kp - K)))
        b = jnp.pad(b, ((0, 0), (0, Kp - K)))

    # ---- VMEM capacity / budget (generation-aware) --------------------------
    try:
        vmem_cap = int(pltpu.get_tpu_info().vmem_capacity_bytes)
    except Exception:  # conservative fallback: v7x per-core floor
        vmem_cap = 64 * 1024 * 1024
    vmem_budget = int(0.85 * vmem_cap)   # headroom for Mosaic internal scratch

    c_sub = _round_up(C, _SUBLANE)

    # ---- spatial chunking -----------------------------------------------------
    # Chunk size capped so (a) per-step DMAs stay large but bounded and
    # (b) at least 8 batch rows of double-buffered x tiles fit in VMEM.
    x_row_budget = (vmem_budget // 2) // _SUBLANE
    max_thw = max(_LANE, (x_row_budget // (2 * c_sub * x_item)) // _LANE * _LANE)
    max_thw = min(2048, max_thw)
    if HW <= max_thw:
        thw, n_chunks = HW, 1
    else:
        n_chunks = _cdiv(HW, max_thw)
        thw = _round_up(_cdiv(HW, n_chunks), _LANE)   # balanced, lane-aligned
        n_chunks = _cdiv(HW, thw)
    multi_chunk = n_chunks > 1
    need_mask = (HW % thw) != 0        # ragged tail -> in-kernel mask (no pad)
    n_groups = thw // _LANE if multi_chunk else 1
    thw_lanes = _round_up(thw, _LANE)

    # ---- kernels --------------------------------------------------------------
    def _masked(xv, j):
        if not need_mask:
            return xv
        lane = jax.lax.broadcasted_iota(jnp.int32, (1, 1, thw), 2)
        return jnp.where(lane < (HW - j * thw), xv, 0)

    if multi_chunk:
        def kernel(x_ref, w_ref, b_ref, o_ref, acc_ref):
            j = pl.program_id(1)

            @pl.when(j == 0)
            def _init():
                acc_ref[...] = jnp.zeros_like(acc_ref)

            xv = _masked(x_ref[...], j)
            # Lane-parallel partial sums: pure VPU adds (bf16 promotes to f32
            # in the add); keeps the per-chunk reduction off the XLU.
            for g in range(n_groups):
                acc_ref[...] += xv[:, :, g * _LANE:(g + 1) * _LANE]

            @pl.when(j == pl.num_programs(1) - 1)
            def _finalize():
                pooled = jnp.sum(acc_ref[...], axis=-1)  # one XLU reduce / tile
                logits = jnp.dot(pooled.astype(w_ref.dtype), w_ref[...],
                                 preferred_element_type=jnp.float32) + b_ref[...]
                o_ref[...] = logits.astype(o_ref.dtype)
    else:
        def kernel(x_ref, w_ref, b_ref, o_ref):
            pooled = jnp.sum(x_ref[...].astype(jnp.float32), axis=-1)
            logits = jnp.dot(pooled.astype(w_ref.dtype), w_ref[...],
                             preferred_element_type=jnp.float32) + b_ref[...]
            o_ref[...] = logits.astype(o_ref.dtype)

    # ---- builder: exact VMEM accounting per resident-buffering choice --------
    def _build(single_buffer_resident):
        w_bufs = 1 if single_buffer_resident else 2
        per_row = (2 * c_sub * thw_lanes * x_item        # x tile (double-buffered)
                   + 2 * Kp * out_item                   # logits tile (double-buffered)
                   + (c_sub * _LANE * 4 if multi_chunk else 0))  # f32 accumulator
        fixed = (w_bufs * c_sub * Kp * w_item            # resident weight
                 + w_bufs * _SUBLANE * Kp * 4)           # resident bias
        avail = vmem_budget - fixed - (2 << 20)

        tn = (avail // per_row) // _SUBLANE * _SUBLANE
        tn = max(_SUBLANE, min(512, tn))                 # amortization plateau
        if N >= 4 * _SUBLANE:
            # Megacore (v7x: 2 TCs): keep >= 4 batch tiles so the "parallel"
            # i axis has work for both cores.
            tn = min(tn, max(_SUBLANE, _round_up(_cdiv(N, 4), _SUBLANE)))
        tn = min(tn, _round_up(N, _SUBLANE))
        if N < _SUBLANE:
            tn = N                                       # block == full tiny batch

        grid = (_cdiv(N, tn), n_chunks)
        vmem_limit = int(min(vmem_budget,
                             max(fixed + tn * per_row + (4 << 20), 32 << 20)))

        res_kw = ({"pipeline_mode": pl.Buffered(1)}
                  if single_buffer_resident else {})
        grid_spec = pltpu.PrefetchScalarGridSpec(
            num_scalar_prefetch=0,
            grid=grid,
            in_specs=[
                pl.BlockSpec((tn, C, thw), lambda i, j: (i, 0, j)),
                pl.BlockSpec((C, Kp), lambda i, j: (0, 0), **res_kw),  # weight
                pl.BlockSpec((1, Kp), lambda i, j: (0, 0), **res_kw),  # bias
            ],
            out_specs=pl.BlockSpec((tn, Kp), lambda i, j: (i, 0)),
            scratch_shapes=([pltpu.VMEM((tn, C, _LANE), jnp.float32)]
                            if multi_chunk else []),
        )
        return pl.pallas_call(
            kernel,
            out_shape=jax.ShapeDtypeStruct((N, Kp), out_dtype),
            grid_spec=grid_spec,
            compiler_params=pltpu.CompilerParams(
                dimension_semantics=("parallel", "arbitrary"),
                vmem_limit_bytes=vmem_limit,
            ),
        )(x, w_t, b)

    try:
        out = _build(True)     # single-buffered resident weight/bias
    except Exception:
        out = _build(False)    # fallback if pipeline_mode=Buffered(1) rejected

    return out if Kp == K else out[:, :K]


if __name__ == "__main__":
    # Small shapes consistent with the module: batch=2, channels=4, spatial 16x16.
    N, C, H, W = 2, 4, 16, 16
    num_classes = 8

    key = jax.random.PRNGKey(0)
    kx, kw, kb = jax.random.split(key, 3)

    x = jax.random.normal(kx, (N, C, H, W), dtype=jnp.float32)
    # Deterministic synthetic parameters (shapes of nn.Linear(C, num_classes)).
    fc_weight = jax.random.normal(kw, (num_classes, C), dtype=jnp.float32) * 0.1
    fc_bias = jax.random.normal(kb, (num_classes,), dtype=jnp.float32) * 0.1

    out = classifier_head(x, fc_weight, fc_bias)
    out = jax.block_until_ready(out)

    # Reference in plain JAX (same semantics as the PyTorch module).
    pooled_ref = jnp.mean(x, axis=(2, 3))                # (N, C)
    ref = pooled_ref @ fc_weight.T + fc_bias             # (N, K)
    assert out.shape == (N, num_classes)
    assert jnp.allclose(out, ref, atol=1e-5, rtol=1e-5), "mismatch vs reference"

    print("KERNEL_OK")
</pallas_src>

<mosaic_0001>
module attributes {stable_mosaic.version = 11 : i64} {
  func.func @kernel(%arg0: i32, %arg1: i32, %arg2: memref<2x4x256xf32, #tpu.memory_space<vmem>>, %arg3: memref<4x128xf32, #tpu.memory_space<vmem>>, %arg4: memref<1x128xf32, #tpu.memory_space<vmem>>, %arg5: memref<2x128xf32, #tpu.memory_space<vmem>>) attributes {dimension_semantics = [#tpu.dimension_semantics<parallel>, #tpu.dimension_semantics<arbitrary>], iteration_bounds = array<i64: 1, 1>, scalar_prefetch = 0 : i64, scratch_operands = 0 : i64, tpu.core_type = #tpu.core_type<tc>, window_params = [{transform_indices = @transform_0, window_bounds = array<i64: 2, 4, 256>}, {pipeline_mode = #tpu.pipeline_mode<synchronous>, transform_indices = @transform_1, window_bounds = array<i64: 4, 128>}, {pipeline_mode = #tpu.pipeline_mode<synchronous>, transform_indices = @transform_2, window_bounds = array<i64: 1, 128>}, {transform_indices = @transform_3, window_bounds = array<i64: 2, 128>}]} {
    %c0 = arith.constant 0 : index
    %c0_0 = arith.constant 0 : index
    %c0_1 = arith.constant 0 : index
    %0 = vector.load %arg2[%c0, %c0_0, %c0_1] : memref<2x4x256xf32, #tpu.memory_space<vmem>>, vector<2x4x256xf32>
    %cst = arith.constant dense<0.000000e+00> : vector<2x4xf32>
    %1 = vector.multi_reduction <add>, %0, %cst [2] : vector<2x4x256xf32> to vector<2x4xf32>
    %c0_2 = arith.constant 0 : index
    %c0_3 = arith.constant 0 : index
    %2 = vector.load %arg3[%c0_2, %c0_3] : memref<4x128xf32, #tpu.memory_space<vmem>>, vector<4x128xf32>
    %cst_4 = arith.constant dense<0.000000e+00> : vector<2x128xf32>
    %3 = tpu.matmul %1, %2, %cst_4 {dimension_numbers = #tpu.dot_dimension_numbers<[1], [0], [0], [1], [0, 0, 1, 1], [], []>} : vector<2x4xf32>, vector<4x128xf32>, vector<2x128xf32> -> vector<2x128xf32>
    %c0_5 = arith.constant 0 : index
    %c0_6 = arith.constant 0 : index
    %4 = vector.load %arg4[%c0_5, %c0_6] : memref<1x128xf32, #tpu.memory_space<vmem>>, vector<1x128xf32>
    %5 = vector.broadcast %4 : vector<1x128xf32> to vector<2x128xf32>
    %6 = arith.addf %3, %5 : vector<2x128xf32>
    %c0_7 = arith.constant 0 : index
    %c0_8 = arith.constant 0 : index
    %7 = vector.load %arg5[%c0_7, %c0_8] : memref<2x128xf32, #tpu.memory_space<vmem>>, vector<2x128xf32>
    tpu.vector_store %arg5[%c0_7, %c0_8], %6 {strides = array<i32>} : memref<2x128xf32, #tpu.memory_space<vmem>>, vector<2x128xf32>,
    return
  }
  func.func @transform_0(%arg0: i32, %arg1: i32) -> (i32, i32, i32) {
    %c0_i32 = arith.constant 0 : i32
    %c0_i32_0 = arith.constant 0 : i32
    return %arg0, %c0_i32, %arg1 : i32, i32, i32
  }
  func.func @transform_1(%arg0: i32, %arg1: i32) -> (i32, i32) {
    %c0_i32 = arith.constant 0 : i32
    %c0_i32_0 = arith.constant 0 : i32
    %c0_i32_1 = arith.constant 0 : i32
    return %c0_i32, %c0_i32_0 : i32, i32
  }
  func.func @transform_2(%arg0: i32, %arg1: i32) -> (i32, i32) {
    %c0_i32 = arith.constant 0 : i32
    %c0_i32_0 = arith.constant 0 : i32
    %c0_i32_1 = arith.constant 0 : i32
    return %c0_i32, %c0_i32_0 : i32, i32
  }
  func.func @transform_3(%arg0: i32, %arg1: i32) -> (i32, i32) {
    %c0_i32 = arith.constant 0 : i32
    %c0_i32_0 = arith.constant 0 : i32
    return %arg0, %c0_i32 : i32, i32
  }
}

module attributes {stable_mosaic.version = 11 : i64} {
  func.func @kernel(%arg0: i32, %arg1: i32, %arg2: memref<2x4x256xf32, #tpu.memory_space<vmem>>, %arg3: memref<4x128xf32, #tpu.memory_space<vmem>>, %arg4: memref<1x128xf32, #tpu.memory_space<vmem>>, %arg5: memref<2x128xf32, #tpu.memory_space<vmem>>) attributes {dimension_semantics = [#tpu.dimension_semantics<parallel>, #tpu.dimension_semantics<arbitrary>], iteration_bounds = array<i64: 1, 1>, scalar_prefetch = 0 : i64, scratch_operands = 0 : i64, tpu.core_type = #tpu.core_type<tc>, window_params = [{transform_indices = @transform_0, window_bounds = array<i64: 2, 4, 256>}, {pipeline_mode = #tpu.pipeline_mode<synchronous>, transform_indices = @transform_1, window_bounds = array<i64: 4, 128>}, {pipeline_mode = #tpu.pipeline_mode<synchronous>, transform_indices = @transform_2, window_bounds = array<i64: 1, 128>}, {transform_indices = @transform_3, window_bounds = array<i64: 2, 128>}]} {
    %c0 = arith.constant 0 : index
    %c0_0 = arith.constant 0 : index
    %c0_1 = arith.constant 0 : index
    %0 = vector.load %arg2[%c0, %c0_0, %c0_1] : memref<2x4x256xf32, #tpu.memory_space<vmem>>, vector<2x4x256xf32>
    %cst = arith.constant dense<0.000000e+00> : vector<2x4xf32>
    %1 = vector.multi_reduction <add>, %0, %cst [2] : vector<2x4x256xf32> to vector<2x4xf32>
    %c0_2 = arith.constant 0 : index
    %c0_3 = arith.constant 0 : index
    %2 = vector.load %arg3[%c0_2, %c0_3] : memref<4x128xf32, #tpu.memory_space<vmem>>, vector<4x128xf32>
    %cst_4 = arith.constant dense<0.000000e+00> : vector<2x128xf32>
    %3 = tpu.matmul %1, %2, %cst_4 {dimension_numbers = #tpu.dot_dimension_numbers<[1], [0], [0], [1], [0, 0, 1, 1], [], []>} : vector<2x4xf32>, vector<4x128xf32>, vector<2x128xf32> -> vector<2x128xf32>
    %c0_5 = arith.constant 0 : index
    %c0_6 = arith.constant 0 : index
    %4 = vector.load %arg4[%c0_5, %c0_6] : memref<1x128xf32, #tpu.memory_space<vmem>>, vector<1x128xf32>
    %5 = vector.broadcast %4 : vector<1x128xf32> to vector<2x128xf32>
    %6 = arith.addf %3, %5 : vector<2x128xf32>
    %c0_7 = arith.constant 0 : index
    %c0_8 = arith.constant 0 : index
    %7 = vector.load %arg5[%c0_7, %c0_8] : memref<2x128xf32, #tpu.memory_space<vmem>>, vector<2x128xf32>
    tpu.vector_store %arg5[%c0_7, %c0_8], %6 {strides = array<i32>} : memref<2x128xf32, #tpu.memory_space<vmem>>, vector<2x128xf32>,
    return
  }
  func.func @transform_0(%arg0: i32, %arg1: i32) -> (i32, i32, i32) {
    %c0_i32 = arith.constant 0 : i32
    %c0_i32_0 = arith.constant 0 : i32
    return %arg0, %c0_i32, %arg1 : i32, i32, i32
  }
  func.func @transform_1(%arg0: i32, %arg1: i32) -> (i32, i32) {
    %c0_i32 = arith.constant 0 : i32
    %c0_i32_0 = arith.constant 0 : i32
    %c0_i32_1 = arith.constant 0 : i32
    return %c0_i32, %c0_i32_0 : i32, i32
  }
  func.func @transform_2(%arg0: i32, %arg1: i32) -> (i32, i32) {
    %c0_i32 = arith.constant 0 : i32
    %c0_i32_0 = arith.constant 0 : i32
    %c0_i32_1 = arith.constant 0 : i32
    return %c0_i32, %c0_i32_0 : i32, i32
  }
  func.func @transform_3(%arg0: i32, %arg1: i32) -> (i32, i32) {
    %c0_i32 = arith.constant 0 : i32
    %c0_i32_0 = arith.constant 0 : i32
    return %arg0, %c0_i32 : i32, i32
  }
}

</mosaic_0001>

<bundles_post_ra>
// kernel: tpu_custom_call.1
= control target key start
LH: loop header
LB: loop body
LE: loop exit
PB: predicated region body
PF: predicated region fallthrough
CT: control target
= control target key end

     0   :  { %8 = vsyncpa [#allocation3], 0  ;;  %s337_s0 = inlined_call_operand.hbm [shape: f32[2,4,256], index: 0, kind: input, shape index: {}]   ;;  %s338_s1 = inlined_call_operand.hbm [shape: f32[4,128], index: 1, kind: input, shape index: {}]   ;;  %s339_s2 = inlined_call_operand.vmem [shape: f32[1,128], index: 2, kind: input, shape index: {}]   ;;  %s340_s3 = inlined_call_operand.hbm [shape: f32[2,128], index: 3, kind: output, shape index: {}]  }
   0x1   :  { %9 = vsyncpa [#allocation6], 0 }
   0x2   :  { %10 = vsyncpa [#allocation4], 0  ;;  %s266_s12 = smov [#allocation2]   ;;  %s194_s16 = scalar_lea.hbm %s337_s0, 256 }
   0x3   :  { %s16_s13 = sshll.u32 %s266_s12, 4  ;;  %p195_p0 = scmp.ne.s32.totalorder %s337_s0, %s194_s16  ;;  %s17_s13 = int_to_ptr.vmem [resolvable:$true] %s16_s13 }
   0x4   :  { %p198_p1 = scmp.lt.u32.totalorder %s194_s16, %s337_s0 }
   0x6   :  { %p200_p2 = pnand %p198_p1, %p195_p0 }
   0x8   :  { %203 = shalt.err (!%p200_p2)
}
   0x9   :  { %s204_s21 = scalar_lea.vmem %s17_s13, 256  ;;  %p209_p4 = scmp.lt.s32.totalorder %s17_s13, %s17_s13 }
   0xa   :  { %p205_p3 = scmp.ne.s32.totalorder %s17_s13, %s204_s21  ;;  %p210_p5 = scmp.lt.s32.totalorder %s204_s21, %s204_s21 }
   0xc   :  { %p211_p6 = por %p210_p5, %p209_p4 }
   0xe   :  { %p212_p7 = pnand %p211_p6, %p205_p3 }
  0x10   :  { %215 = shalt.err (!%p212_p7)
}
  0x11   :  { %s267_s22 = smov 128   ;;  %s268_s23 = smov 8  }
  0x12   :  { %22 = dma.hbm_to_vmem [thread:$0]  %s337_s0, 256, %s17_s13, [#allocation3], %s267_s22, %s267_s22, %s268_s23  }
  0x13   :  { %s269_s26 = smov [#allocation5]   ;;  %s216_s30 = scalar_lea.hbm %s338_s1, 64 }
  0x14   :  { %s29_s27 = sshll.u32 %s269_s26, 4  ;;  %p217_p8 = scmp.ne.s32.totalorder %s338_s1, %s216_s30  ;;  %s30_s27 = int_to_ptr.vmem [resolvable:$true] %s29_s27 }
  0x15   :  { %p220_p9 = scmp.lt.u32.totalorder %s216_s30, %s338_s1 }
  0x17   :  { %p222_p10 = pnand %p220_p9, %p217_p8 }
  0x19   :  { %225 = shalt.err (!%p222_p10)
}
  0x1a   :  { %s226_s8 = scalar_lea.vmem %s30_s27, 64  ;;  %p231_p12 = scmp.lt.s32.totalorder %s30_s27, %s30_s27 }
  0x1b   :  { %p227_p11 = scmp.ne.s32.totalorder %s30_s27, %s226_s8  ;;  %p232_p13 = scmp.lt.s32.totalorder %s226_s8, %s226_s8 }
  0x1d   :  { %p233_p0 = por %p232_p13, %p231_p12 }
  0x1f   :  { %p234_p1 = pnand %p233_p0, %p227_p11 }
  0x21   :  { %237 = shalt.err (!%p234_p1)
}
  0x22   :  { %32 = dma.hbm_to_vmem [thread:$0]  %s338_s1, 64, %s30_s27, [#allocation6]  }
  0x23   :  { %260 = dma.done.wait [#allocation3], 256  }
  0x24   :  { %261 = vsyncadd [#allocation3], 4294967040 }
  0x25   :  { %262 = dma.done.wait [#allocation6], 64  }
  0x26   :  { %263 = vsyncadd [#allocation6], 4294967232  ;;  %vm49_vm0 = vcmask 1043456   ;;  %v41_v0 = vld [vmem:[#allocation2] sm:$0xff]  ;;  %v42_v1 = vld [vmem:[#allocation2 + $0x8] sm:$0xff]  ;;  %v270_v11 = vmov 0.0   ;;  %v70_v12 = vlaneseq }
  0x27   :  { %v45_v2 = vcombine.high %v41_v0, %v41_v0  ;;  %v50_v3 = vsel %vm49_vm0, %v41_v0, 0.0  ;;  %v46_v4 = vcombine.high %v42_v1, %v42_v1  ;;  %v55_v6 = vsel %vm49_vm0, %v42_v1, 0.0  ;;  %v60_v10 = vld [vmem:[#allocation5] sm:$0xf]  ;;  %180 = vmatprep.subr.mxu0 %v270_v11  ;;  %v175_v21 = vld [vmem:[%s339_s2] ss:$0 sm:$0xff] }
  0x28   :  { %vm271_vm1 = vmmov 0   ;;  %181 = vmatpush3.msk.msra.mxu0 %vm49_vm0, %v60_v10  ;;  %v71_v13 = vand.u32 127, %v70_v12  ;;  %v73_v14 = vshrl.u32 %v70_v12, 7  ;;  %vm80_vm2 = vcmask 1041409   ;;  %s272_s11 = smov [#allocation7]  }
  0x29   :  { %v51_v5 = vsel %vm49_vm0, %v45_v2, 0.0  ;;  %v56_v7 = vsel %vm49_vm0, %v46_v4, 0.0  ;;  %182 = vmatprep.mubr.msk.f32.mxu0 %vm271_vm1, %v270_v11  ;;  %vm82_vm3 = vcmask 31744   ;;  %s165_s12 = sshll.u32 %s272_s11, 4  ;;  %s166_s12 = int_to_ptr.vmem [resolvable:$true] %s165_s12 }
  0x2a   :  { %v52_v8 = vadd.f32 %v51_v5, %v50_v3  ;;  %v57_v9 = vadd.f32 %v56_v7, %v55_v6  ;;  %v74_v16 = vsub.s32 %v71_v13, %v73_v14  ;;  %s238_s13 = scalar_lea.vmem %s166_s12, 32  ;;  %p243_p3 = scmp.lt.s32.totalorder %s166_s12, %s166_s12 }
  0x2b   :  { %p239_p2 = scmp.ne.s32.totalorder %s166_s12, %s238_s13  ;;  %p244_p4 = scmp.lt.s32.totalorder %s238_s13, %s238_s13 }
  0x2c   :  { %53 = vadd.xlane.f32.xlu0 %v52_v8 }
  0x2d   :  { %p245_p5 = por %p244_p4, %p243_p3 }
  0x2f   :  { %p246_p6 = pnand %p245_p5, %p239_p2 }
  0x30   :  { %58 = vadd.xlane.f32.xlu0 %v57_v9 }
  0xb9   :  { %v54_v15 = vpop.xlane.xlu0 %53 }
  0xba   :  { %v75_v18 = vrot.slane %v54_v15, %v74_v16 }
  0xbd   :  { %v59_v17 = vpop.xlane.xlu0 %58 }
  0xbe   :  { %v79_v19 = vrot.slane %v59_v17, %v74_v16 }
  0xc0   :  { %v81_v20 = vsel %vm80_vm2, %v79_v19, %v75_v18 }
  0xc1   :  { %183 = vmatmul.mubr.msk.f32.vlgmr.msra.gmra.mrb[0].mxu0 %vm82_vm3, %v81_v20 }
 0x194   :  { %v154_v22 = vpop.f32.mrb[0].mxu0 }
 0x195   :  { %v155_v23 = vadd.f32 %v175_v21, %v154_v22  ;;  %v184_v24 = vpop.f32.mrb[1].mxu0 }
 0x197   :  { %158 = vst [vmem:[#allocation7] sm:$0x3] %v155_v23 }
 0x198   :  { %249 = shalt.err (!%p246_p6)
}
 0x199   :  { %s250_s16 = scalar_lea.hbm %s340_s3, 32 }
 0x19a   :  { %p251_p7 = scmp.ne.s32.totalorder %s340_s3, %s250_s16  ;;  %p254_p8 = scmp.lt.u32.totalorder %s250_s16, %s340_s3 }
 0x19c   :  { %p256_p9 = pnand %p254_p8, %p251_p7 }
 0x19e   :  { %259 = shalt.err (!%p256_p9)
}
 0x19f   :  { %168 = dma.vmem_to_hbm [thread:$0]  %s166_s12, 32, %s340_s3, [#allocation4]  }
 0x1a0   :  { %264 = dma.done.wait [#allocation4], 32  }
 0x1a1   :  { %265 = vsyncadd [#allocation4], 4294967264 }
 0x1a2   :  { %172 = vsyncpa [#allocation3], 1 }
 0x1a3   :  { %173 = vsyncpa [#allocation6], 1 }
 0x1a4   :  { %174 = vsyncpa [#allocation4], 1 }

// kernel: tpu_custom_call.1
= control target key start
LH: loop header
LB: loop body
LE: loop exit
PB: predicated region body
PF: predicated region fallthrough
CT: control target
= control target key end

     0   :  { %8 = vsyncpa [#allocation3], 0  ;;  %s337_s0 = inlined_call_operand.hbm [shape: f32[2,4,256], index: 0, kind: input, shape index: {}]   ;;  %s338_s1 = inlined_call_operand.hbm [shape: f32[4,128], index: 1, kind: input, shape index: {}]   ;;  %s339_s2 = inlined_call_operand.vmem [shape: f32[1,128], index: 2, kind: input, shape index: {}]   ;;  %s340_s3 = inlined_call_operand.hbm [shape: f32[2,128], index: 3, kind: output, shape index: {}]  }
   0x1   :  { %9 = vsyncpa [#allocation6], 0 }
   0x2   :  { %10 = vsyncpa [#allocation4], 0  ;;  %s266_s12 = smov [#allocation2]   ;;  %s194_s16 = scalar_lea.hbm %s337_s0, 256 }
   0x3   :  { %s16_s13 = sshll.u32 %s266_s12, 4  ;;  %p195_p0 = scmp.ne.s32.totalorder %s337_s0, %s194_s16  ;;  %s17_s13 = int_to_ptr.vmem [resolvable:$true] %s16_s13 }
   0x4   :  { %p198_p1 = scmp.lt.u32.totalorder %s194_s16, %s337_s0 }
   0x6   :  { %p200_p2 = pnand %p198_p1, %p195_p0 }
   0x8   :  { %203 = shalt.err (!%p200_p2)
}
   0x9   :  { %s204_s21 = scalar_lea.vmem %s17_s13, 256  ;;  %p209_p4 = scmp.lt.s32.totalorder %s17_s13, %s17_s13 }
   0xa   :  { %p205_p3 = scmp.ne.s32.totalorder %s17_s13, %s204_s21  ;;  %p210_p5 = scmp.lt.s32.totalorder %s204_s21, %s204_s21 }
   0xc   :  { %p211_p6 = por %p210_p5, %p209_p4 }
   0xe   :  { %p212_p7 = pnand %p211_p6, %p205_p3 }
  0x10   :  { %215 = shalt.err (!%p212_p7)
}
  0x11   :  { %s267_s22 = smov 128   ;;  %s268_s23 = smov 8  }
  0x12   :  { %22 = dma.hbm_to_vmem [thread:$0]  %s337_s0, 256, %s17_s13, [#allocation3], %s267_s22, %s267_s22, %s268_s23  }
  0x13   :  { %s269_s26 = smov [#allocation5]   ;;  %s216_s30 = scalar_lea.hbm %s338_s1, 64 }
  0x14   :  { %s29_s27 = sshll.u32 %s269_s26, 4  ;;  %p217_p8 = scmp.ne.s32.totalorder %s338_s1, %s216_s30  ;;  %s30_s27 = int_to_ptr.vmem [resolvable:$true] %s29_s27 }
  0x15   :  { %p220_p9 = scmp.lt.u32.totalorder %s216_s30, %s338_s1 }
  0x17   :  { %p222_p10 = pnand %p220_p9, %p217_p8 }
  0x19   :  { %225 = shalt.err (!%p222_p10)
}
  0x1a   :  { %s226_s8 = scalar_lea.vmem %s30_s27, 64  ;;  %p231_p12 = scmp.lt.s32.totalorder %s30_s27, %s30_s27 }
  0x1b   :  { %p227_p11 = scmp.ne.s32.totalorder %s30_s27, %s226_s8  ;;  %p232_p13 = scmp.lt.s32.totalorder %s226_s8, %s226_s8 }
  0x1d   :  { %p233_p0 = por %p232_p13, %p231_p12 }
  0x1f   :  { %p234_p1 = pnand %p233_p0, %p227_p11 }
  0x21   :  { %237 = shalt.err (!%p234_p1)
}
  0x22   :  { %32 = dma.hbm_to_vmem [thread:$0]  %s338_s1, 64, %s30_s27, [#allocation6]  }
  0x23   :  { %260 = dma.done.wait [#allocation3], 256  }
  0x24   :  { %261 = vsyncadd [#allocation3], 4294967040 }
  0x25   :  { %262 = dma.done.wait [#allocation6], 64  }
  0x26   :  { %263 = vsyncadd [#allocation6], 4294967232  ;;  %vm49_vm0 = vcmask 1043456   ;;  %v41_v0 = vld [vmem:[#allocation2] sm:$0xff]  ;;  %v42_v1 = vld [vmem:[#allocation2 + $0x8] sm:$0xff]  ;;  %v270_v11 = vmov 0.0   ;;  %v70_v12 = vlaneseq }
  0x27   :  { %v45_v2 = vcombine.high %v41_v0, %v41_v0  ;;  %v50_v3 = vsel %vm49_vm0, %v41_v0, 0.0  ;;  %v46_v4 = vcombine.high %v42_v1, %v42_v1  ;;  %v55_v6 = vsel %vm49_vm0, %v42_v1, 0.0  ;;  %v60_v10 = vld [vmem:[#allocation5] sm:$0xf]  ;;  %180 = vmatprep.subr.mxu0 %v270_v11  ;;  %v175_v21 = vld [vmem:[%s339_s2] ss:$0 sm:$0xff] }
  0x28   :  { %vm271_vm1 = vmmov 0   ;;  %181 = vmatpush3.msk.msra.mxu0 %vm49_vm0, %v60_v10  ;;  %v71_v13 = vand.u32 127, %v70_v12  ;;  %v73_v14 = vshrl.u32 %v70_v12, 7  ;;  %vm80_vm2 = vcmask 1041409   ;;  %s272_s11 = smov [#allocation7]  }
  0x29   :  { %v51_v5 = vsel %vm49_vm0, %v45_v2, 0.0  ;;  %v56_v7 = vsel %vm49_vm0, %v46_v4, 0.0  ;;  %182 = vmatprep.mubr.msk.f32.mxu0 %vm271_vm1, %v270_v11  ;;  %vm82_vm3 = vcmask 31744   ;;  %s165_s12 = sshll.u32 %s272_s11, 4  ;;  %s166_s12 = int_to_ptr.vmem [resolvable:$true] %s165_s12 }
  0x2a   :  { %v52_v8 = vadd.f32 %v51_v5, %v50_v3  ;;  %v57_v9 = vadd.f32 %v56_v7, %v55_v6  ;;  %v74_v16 = vsub.s32 %v71_v13, %v73_v14  ;;  %s238_s13 = scalar_lea.vmem %s166_s12, 32  ;;  %p243_p3 = scmp.lt.s32.totalorder %s166_s12, %s166_s12 }
  0x2b   :  { %p239_p2 = scmp.ne.s32.totalorder %s166_s12, %s238_s13  ;;  %p244_p4 = scmp.lt.s32.totalorder %s238_s13, %s238_s13 }
  0x2c   :  { %53 = vadd.xlane.f32.xlu0 %v52_v8 }
  0x2d   :  { %p245_p5 = por %p244_p4, %p243_p3 }
  0x2f   :  { %p246_p6 = pnand %p245_p5, %p239_p2 }
  0x30   :  { %58 = vadd.xlane.f32.xlu0 %v57_v9 }
  0xb9   :  { %v54_v15 = vpop.xlane.xlu0 %53 }
  0xba   :  { %v75_v18 = vrot.slane %v54_v15, %v74_v16 }
  0xbd   :  { %v59_v17 = vpop.xlane.xlu0 %58 }
  0xbe   :  { %v79_v19 = vrot.slane %v59_v17, %v74_v16 }
  0xc0   :  { %v81_v20 = vsel %vm80_vm2, %v79_v19, %v75_v18 }
  0xc1   :  { %183 = vmatmul.mubr.msk.f32.vlgmr.msra.gmra.mrb[0].mxu0 %vm82_vm3, %v81_v20 }
 0x194   :  { %v154_v22 = vpop.f32.mrb[0].mxu0 }
 0x195   :  { %v155_v23 = vadd.f32 %v175_v21, %v154_v22  ;;  %v184_v24 = vpop.f32.mrb[1].mxu0 }
 0x197   :  { %158 = vst [vmem:[#allocation7] sm:$0x3] %v155_v23 }
 0x198   :  { %249 = shalt.err (!%p246_p6)
}
 0x199   :  { %s250_s16 = scalar_lea.hbm %s340_s3, 32 }
 0x19a   :  { %p251_p7 = scmp.ne.s32.totalorder %s340_s3, %s250_s16  ;;  %p254_p8 = scmp.lt.u32.totalorder %s250_s16, %s340_s3 }
 0x19c   :  { %p256_p9 = pnand %p254_p8, %p251_p7 }
 0x19e   :  { %259 = shalt.err (!%p256_p9)
}
 0x19f   :  { %168 = dma.vmem_to_hbm [thread:$0]  %s166_s12, 32, %s340_s3, [#allocation4]  }
 0x1a0   :  { %264 = dma.done.wait [#allocation4], 32  }
 0x1a1   :  { %265 = vsyncadd [#allocation4], 4294967264 }
 0x1a2   :  { %172 = vsyncpa [#allocation3], 1 }
 0x1a3   :  { %173 = vsyncpa [#allocation6], 1 }
 0x1a4   :  { %174 = vsyncpa [#allocation4], 1 }

</bundles_post_ra>
